<compile_context>
chip_gen: v7x
topology: tpu7x:2x2x1
jax: 0.10.0
libtpu: 0.0.40
codegen_flags: <defaults>
</compile_context>

<pallas_src>
import jax
import jax.numpy as jnp
from jax.experimental import pallas as pl
from jax.experimental.pallas import tpu as pltpu


def _vmem_spec():
    return pl.BlockSpec(memory_space=pltpu.MemorySpace.VMEM)


def _default_vmem_limit():
    # v5e/v6e: 128 MiB physical -> ~96 MiB scoped; v7x: 64 MiB -> ~48 MiB.
    try:
        cap = pltpu.get_tpu_info().vmem_capacity_bytes
        return int(min(96 * 1024 * 1024, (cap * 3) // 4))
    except Exception:
        return 32 * 1024 * 1024


_COMPILER_PARAMS = pltpu.CompilerParams(vmem_limit_bytes=_default_vmem_limit())


# ----------------------------------------------------------------------------
# Fused SAGEConv stack kernel
# ----------------------------------------------------------------------------
def make_sage_stack_kernel(n_layers):
    """x <- relu( (A@x)*(1/deg) @ Wl + x @ Wr + b ), n_layers times, all in VMEM."""

    def kernel(*refs):
        adj_ref, dinv_ref, x_ref = refs[0], refs[1], refs[2]
        out_ref = refs[-1]
        adj = adj_ref[...]                       # bf16 neighbour counts [N, N]
        dinv = dinv_ref[...]                     # f32 1/degree [N, 1]
        x = x_ref[...]                           # f32 activations [N, F]
        idx = 3
        for _ in range(n_layers):
            wl_ref, wr_ref, b_ref = refs[idx], refs[idx + 1], refs[idx + 2]
            idx += 3
            x_bf = x.astype(jnp.bfloat16)
            # mean aggregation: f32 accumulate, f32 divide (exact bf16 counts)
            agg = jnp.dot(adj, x_bf, preferred_element_type=jnp.float32) * dinv
            out = (jnp.dot(agg.astype(jnp.bfloat16), wl_ref[...],
                           preferred_element_type=jnp.float32)
                   + jnp.dot(x_bf, wr_ref[...],
                             preferred_element_type=jnp.float32)
                   + b_ref[...])
            x = jnp.maximum(out, 0.0)            # ReLU / bias stay f32 (VPU)
        out_ref[...] = x

    return kernel


def sage_stack(adj_counts_bf16, inv_deg, x, sage_params):
    """sage_params: list of (Wl bf16 [Fin,Fout], Wr bf16 [Fin,Fout], bias f32 [1,Fout])."""
    n_layers = len(sage_params)
    n = x.shape[0]
    f_out = sage_params[-1][0].shape[1]
    args = [adj_counts_bf16, inv_deg, x]
    for wl, wr, b in sage_params:
        args += [wl, wr, b]
    return pl.pallas_call(
        make_sage_stack_kernel(n_layers),
        out_shape=jax.ShapeDtypeStruct((n, f_out), jnp.float32),
        in_specs=[_vmem_spec() for _ in args],
        out_specs=_vmem_spec(),
        compiler_params=_COMPILER_PARAMS,
    )(*args)


# ----------------------------------------------------------------------------
# Fused tail kernel: sort-pool gather + Conv1d stack + dense stack (+ output)
# ----------------------------------------------------------------------------
def make_tail_kernel(n_conv, ksize, n_dense_rest, batch, k):
    """Per-graph (static loop) so every dot is 2-D:
       gather top-k sorted node rows -> per-tap Conv1d + ReLU -> dense stack.
       NCW permute & channel-major flatten are folded into weight layouts."""

    def kernel(*refs):
        order_ref, x_ref = refs[0], refs[1]      # SMEM int32 [B*k], VMEM f32 [N,F]
        out_ref, xs_ref = refs[-2], refs[-1]
        param_refs = refs[2:-2]

        for b in range(batch):                   # static, small batch
            # ---- SortAggregation gather: top-k rows of x into xs_ref[b] ----
            for l in range(k):
                idx = order_ref[b * k + l]
                xs_ref[b, pl.ds(l, 1), :] = x_ref[pl.ds(idx, 1), :]
            cur = xs_ref[b]                      # f32 [k, F]  (F = channels)

            pi = 0
            # ---- 1D convolutions: per-tap accumulation (no im2col) ---------
            for _ in range(n_conv):
                w_ref, b_ref = param_refs[pi], param_refs[pi + 1]
                pi += 2
                lout = cur.shape[0] - ksize + 1
                cout = w_ref.shape[-1]
                acc = jnp.zeros((lout, cout), jnp.float32)
                for kk in range(ksize):          # static taps
                    acc = acc + jnp.dot(
                        cur[kk:kk + lout, :].astype(jnp.bfloat16), w_ref[kk],
                        preferred_element_type=jnp.float32)
                cur = jnp.maximum(acc + b_ref[...], 0.0)     # [lout, Cout]

            # ---- dropout is identity in eval mode --------------------------
            # TODO(synk): training-mode dropout not implemented (eval forward only).

            # ---- first dense layer: contract over (position, channel) ------
            w1_ref, b1_ref = param_refs[pi], param_refs[pi + 1]
            pi += 2
            d1 = w1_ref.shape[-1]
            acc = jnp.zeros((1, d1), jnp.float32)
            for l in range(cur.shape[0]):        # static, = k - n_conv*(K-1)
                acc = acc + jnp.dot(cur[l:l + 1, :].astype(jnp.bfloat16),
                                    w1_ref[l],
                                    preferred_element_type=jnp.float32)
            x2 = jnp.maximum(acc + b1_ref[...], 0.0)

            # ---- remaining dense layers + output layer, all ReLU -----------
            for _ in range(n_dense_rest):
                w_ref, b_ref = param_refs[pi], param_refs[pi + 1]
                pi += 2
                x2 = jnp.maximum(
                    jnp.dot(x2.astype(jnp.bfloat16), w_ref[...],
                            preferred_element_type=jnp.float32) + b_ref[...],
                    0.0)

            out_ref[pl.ds(b, 1), :] = x2

    return kernel


def dgcnn_tail(order, x_nodes, conv_params, dense1, dense_rest, *,
               ksize, batch_size, k):
    n_out = dense_rest[-1][0].shape[1]
    feat = x_nodes.shape[1]
    args = [order, x_nodes]
    for w, b in conv_params:
        args += [w, b]
    args += [dense1[0], dense1[1]]
    for w, b in dense_rest:
        args += [w, b]
    in_specs = ([pl.BlockSpec(memory_space=pltpu.MemorySpace.SMEM)]
                + [_vmem_spec() for _ in args[1:]])
    return pl.pallas_call(
        make_tail_kernel(len(conv_params), ksize, len(dense_rest),
                         batch_size, k),
        out_shape=jax.ShapeDtypeStruct((batch_size, n_out), jnp.float32),
        in_specs=in_specs,
        out_specs=_vmem_spec(),
        scratch_shapes=[pltpu.VMEM((batch_size, k, feat), jnp.float32)],
        compiler_params=_COMPILER_PARAMS,
    )(*args)


# ----------------------------------------------------------------------------
# Plain-JAX glue
# ----------------------------------------------------------------------------
def build_adj_counts(edge_index, num_nodes):
    """Dense incoming-edge counts (exact in bf16) + f32 1/degree, so that
    ((A @ x) * inv_deg)[i] = mean_{j->i} x[j]."""
    # TODO(synk): at realistic graph sizes use a sparse segment-mean gather
    #             (avg degree ~2) instead of a dense [N,N] adjacency.
    src, dst = edge_index
    adj = jnp.zeros((num_nodes, num_nodes), jnp.float32).at[dst, src].add(1.0)
    deg = adj.sum(axis=1, keepdims=True)
    inv_deg = 1.0 / jnp.maximum(deg, 1.0)
    return adj.astype(jnp.bfloat16), inv_deg


def sort_order(x_nodes, batch_size, nodes_per_graph, k):
    """SortAggregation order: per graph, node indices of the top-k rows sorted
    descending by the last feature (global node indices, flat [B*k] int32)."""
    # TODO(synk): zero-padding for graphs with fewer than k nodes is not exercised
    #             (all graphs here have nodes_per_graph >= k); tie-breaking may
    #             differ from PyTorch's stable sort on exact value collisions.
    key_feat = x_nodes[:, -1].reshape(batch_size, nodes_per_graph)
    order = jnp.argsort(-key_feat, axis=1)[:, :k]                  # [B, k] local
    offsets = (jnp.arange(batch_size, dtype=order.dtype)
               * nodes_per_graph)[:, None]
    return (order + offsets).reshape(-1).astype(jnp.int32)         # [B*k] global


def dgcnn_forward(params, x_nodes, adj_counts_bf16, inv_deg, *, batch_size,
                  nodes_per_graph, k, kernel_size):
    # SAGEConv stack (conv1 + convs), fused into one kernel
    x_nodes = sage_stack(adj_counts_bf16, inv_deg, x_nodes, params["sage"])

    # SortAggregation order in XLA; the gather + Conv1d stack + dense stack
    # run fused in the tail kernel.
    order = sort_order(x_nodes, batch_size, nodes_per_graph, k)
    return dgcnn_tail(order, x_nodes, params["conv1d"], params["dense1"],
                      params["dense_rest"], ksize=kernel_size,
                      batch_size=batch_size, k=k)


# ----------------------------------------------------------------------------
# Deterministic parameter init (PyTorch-style uniform(-1/sqrt(fan_in), +))
# ----------------------------------------------------------------------------
def uinit(key, shape, fan_in):
    bound = 1.0 / float(fan_in) ** 0.5
    return jax.random.uniform(key, shape, jnp.float32, -bound, bound)


if __name__ == "__main__":
    # Model hyper-parameters (consistent with DGCNN.__init__)
    num_features = 8                       # dataset.num_node_features
    graph_conv_layer_sizes = [32, 32]
    sort_pool_k = 8
    sizes_1d_convolutions = [32]
    dense_layer_sizes = [32]
    num_activities = 8                     # len(activities_index)
    kernel_size = min(sort_pool_k, len(graph_conv_layer_sizes))   # = 2

    # Small synthetic batch of graphs
    batch_size = 2
    nodes_per_graph = 12
    num_nodes = batch_size * nodes_per_graph

    key = jax.random.PRNGKey(0)
    keys = jax.random.split(key, 16)

    # Node features
    x = jax.random.normal(keys[0], (num_nodes, num_features), jnp.float32)

    # Deterministic edge_index: per graph, a forward chain plus skip connections
    src_list, dst_list = [], []
    for g in range(batch_size):
        off = g * nodes_per_graph
        for i in range(nodes_per_graph - 1):
            src_list.append(off + i)
            dst_list.append(off + i + 1)
        for i in range(nodes_per_graph - 2):
            src_list.append(off + i)
            dst_list.append(off + i + 2)
    edge_index = jnp.array([src_list, dst_list], dtype=jnp.int32)
    adj_counts_bf16, inv_deg = build_adj_counts(edge_index, num_nodes)

    # ------------------------------------------------------------------ params
    params = {"sage": [], "conv1d": [], "dense1": None, "dense_rest": []}
    ki = 1

    # SAGEConv layers: lin_l (aggregated neighbours, with bias) + lin_r (root,
    # no bias), kept as SEPARATE projections (two dots in-kernel, no lane concat).
    sage_dims = [num_features] + graph_conv_layer_sizes
    for fin, fout in zip(sage_dims[:-1], sage_dims[1:]):
        wl = uinit(keys[ki], (fin, fout), fin); ki += 1
        bl = uinit(keys[ki], (1, fout), fin);   ki += 1
        wr = uinit(keys[ki], (fin, fout), fin); ki += 1
        params["sage"].append((wl.astype(jnp.bfloat16),
                               wr.astype(jnp.bfloat16), bl))

    # Conv1d layers: weight pre-arranged for per-tap dots ([Cout,Cin,K] -> [K,Cin,Cout]).
    conv_dims = [graph_conv_layer_sizes[-1]] + sizes_1d_convolutions
    for cin, cout in zip(conv_dims[:-1], conv_dims[1:]):
        w = uinit(keys[ki], (cout, cin, kernel_size), cin * kernel_size); ki += 1
        b = uinit(keys[ki], (1, cout), cin * kernel_size);                ki += 1
        w3d = jnp.transpose(w, (2, 1, 0))            # [K, Cin, Cout]
        params["conv1d"].append((w3d.astype(jnp.bfloat16), b))

    # First dense layer: torch flattens [B, Cout, Lout] channel-major; we keep
    # the conv output as [Lout, Cout], so permute the weight to [Lout, Cout, d1].
    final_len = sort_pool_k - len(sizes_1d_convolutions) * (kernel_size - 1)
    c_last = sizes_1d_convolutions[-1]
    flat_in = c_last * final_len           # == dense_layer_sizes[0]*(k - K + 1) here
    d1 = dense_layer_sizes[0]
    w1 = uinit(keys[ki], (d1, flat_in), flat_in); ki += 1
    b1 = uinit(keys[ki], (1, d1), flat_in);       ki += 1
    w1_3d = jnp.transpose(w1.reshape(d1, c_last, final_len), (2, 1, 0))
    params["dense1"] = (w1_3d.astype(jnp.bfloat16), b1)

    # Chained linears + linear_output, pre-transposed to [in, out]
    rest_dims = list(zip(dense_layer_sizes, dense_layer_sizes[1:])) + \
                [(dense_layer_sizes[-1], num_activities)]
    for fin, fout in rest_dims:
        w = uinit(keys[ki], (fout, fin), fin); ki += 1
        b = uinit(keys[ki], (1, fout), fin);   ki += 1
        params["dense_rest"].append((w.T.astype(jnp.bfloat16), b))

    # ------------------------------------------------------------------ run
    out = dgcnn_forward(params, x, adj_counts_bf16, inv_deg,
                        batch_size=batch_size,
                        nodes_per_graph=nodes_per_graph,
                        k=sort_pool_k,
                        kernel_size=kernel_size)
    out = jax.block_until_ready(out)
    assert out.shape == (batch_size, num_activities), out.shape
    assert bool(jnp.all(jnp.isfinite(out)))
    print("KERNEL_OK")
</pallas_src>

<mosaic_0001>
module attributes {stable_mosaic.version = 11 : i64} {
  func.func @kernel(%arg0: memref<24x24xbf16, #tpu.memory_space<vmem>>, %arg1: memref<24x1xf32, #tpu.memory_space<vmem>>, %arg2: memref<24x8xf32, #tpu.memory_space<vmem>>, %arg3: memref<8x32xbf16, #tpu.memory_space<vmem>>, %arg4: memref<8x32xbf16, #tpu.memory_space<vmem>>, %arg5: memref<1x32xf32, #tpu.memory_space<vmem>>, %arg6: memref<32x32xbf16, #tpu.memory_space<vmem>>, %arg7: memref<32x32xbf16, #tpu.memory_space<vmem>>, %arg8: memref<1x32xf32, #tpu.memory_space<vmem>>, %arg9: memref<24x32xf32, #tpu.memory_space<vmem>>) attributes {dimension_semantics = [], scalar_prefetch = 0 : i64, scratch_operands = 0 : i64, tpu.core_type = #tpu.core_type<tc>} {
    %c0 = arith.constant 0 : index
    %c0_0 = arith.constant 0 : index
    %0 = vector.load %arg0[%c0, %c0_0] : memref<24x24xbf16, #tpu.memory_space<vmem>>, vector<24x24xbf16>
    %c0_1 = arith.constant 0 : index
    %c0_2 = arith.constant 0 : index
    %1 = vector.load %arg1[%c0_1, %c0_2] : memref<24x1xf32, #tpu.memory_space<vmem>>, vector<24x1xf32>
    %c0_3 = arith.constant 0 : index
    %c0_4 = arith.constant 0 : index
    %2 = vector.load %arg2[%c0_3, %c0_4] : memref<24x8xf32, #tpu.memory_space<vmem>>, vector<24x8xf32>
    %3 = arith.truncf %2 : vector<24x8xf32> to vector<24x8xbf16>
    %cst = arith.constant dense<0.000000e+00> : vector<24x8xf32>
    %4 = tpu.matmul %0, %3, %cst {dimension_numbers = #tpu.dot_dimension_numbers<[1], [0], [0], [1], [0, 0, 1, 1], [], []>} : vector<24x24xbf16>, vector<24x8xbf16>, vector<24x8xf32> -> vector<24x8xf32>
    %5 = vector.broadcast %1 : vector<24x1xf32> to vector<24x8xf32>
    %6 = arith.mulf %4, %5 : vector<24x8xf32>
    %7 = arith.truncf %6 : vector<24x8xf32> to vector<24x8xbf16>
    %c0_5 = arith.constant 0 : index
    %c0_6 = arith.constant 0 : index
    %8 = vector.load %arg3[%c0_5, %c0_6] : memref<8x32xbf16, #tpu.memory_space<vmem>>, vector<8x32xbf16>
    %cst_7 = arith.constant dense<0.000000e+00> : vector<24x32xf32>
    %9 = tpu.matmul %7, %8, %cst_7 {dimension_numbers = #tpu.dot_dimension_numbers<[1], [0], [0], [1], [0, 0, 1, 1], [], []>} : vector<24x8xbf16>, vector<8x32xbf16>, vector<24x32xf32> -> vector<24x32xf32>
    %c0_8 = arith.constant 0 : index
    %c0_9 = arith.constant 0 : index
    %10 = vector.load %arg4[%c0_8, %c0_9] : memref<8x32xbf16, #tpu.memory_space<vmem>>, vector<8x32xbf16>
    %cst_10 = arith.constant dense<0.000000e+00> : vector<24x32xf32>
    %11 = tpu.matmul %3, %10, %cst_10 {dimension_numbers = #tpu.dot_dimension_numbers<[1], [0], [0], [1], [0, 0, 1, 1], [], []>} : vector<24x8xbf16>, vector<8x32xbf16>, vector<24x32xf32> -> vector<24x32xf32>
    %12 = arith.addf %9, %11 : vector<24x32xf32>
    %c0_11 = arith.constant 0 : index
    %c0_12 = arith.constant 0 : index
    %13 = vector.load %arg5[%c0_11, %c0_12] : memref<1x32xf32, #tpu.memory_space<vmem>>, vector<1x32xf32>
    %14 = vector.broadcast %13 : vector<1x32xf32> to vector<24x32xf32>
    %15 = arith.addf %12, %14 : vector<24x32xf32>
    %cst_13 = arith.constant 0.000000e+00 : f32
    %16 = vector.broadcast %cst_13 : f32 to vector<24x32xf32>
    %17 = arith.maximumf %15, %16 : vector<24x32xf32>
    %18 = arith.truncf %17 : vector<24x32xf32> to vector<24x32xbf16>
    %cst_14 = arith.constant dense<0.000000e+00> : vector<24x32xf32>
    %19 = tpu.matmul %0, %18, %cst_14 {dimension_numbers = #tpu.dot_dimension_numbers<[1], [0], [0], [1], [0, 0, 1, 1], [], []>} : vector<24x24xbf16>, vector<24x32xbf16>, vector<24x32xf32> -> vector<24x32xf32>
    %20 = vector.broadcast %1 : vector<24x1xf32> to vector<24x32xf32>
    %21 = arith.mulf %19, %20 : vector<24x32xf32>
    %22 = arith.truncf %21 : vector<24x32xf32> to vector<24x32xbf16>
    %c0_15 = arith.constant 0 : index
    %c0_16 = arith.constant 0 : index
    %23 = vector.load %arg6[%c0_15, %c0_16] : memref<32x32xbf16, #tpu.memory_space<vmem>>, vector<32x32xbf16>
    %cst_17 = arith.constant dense<0.000000e+00> : vector<24x32xf32>
    %24 = tpu.matmul %22, %23, %cst_17 {dimension_numbers = #tpu.dot_dimension_numbers<[1], [0], [0], [1], [0, 0, 1, 1], [], []>} : vector<24x32xbf16>, vector<32x32xbf16>, vector<24x32xf32> -> vector<24x32xf32>
    %c0_18 = arith.constant 0 : index
    %c0_19 = arith.constant 0 : index
    %25 = vector.load %arg7[%c0_18, %c0_19] : memref<32x32xbf16, #tpu.memory_space<vmem>>, vector<32x32xbf16>
    %cst_20 = arith.constant dense<0.000000e+00> : vector<24x32xf32>
    %26 = tpu.matmul %18, %25, %cst_20 {dimension_numbers = #tpu.dot_dimension_numbers<[1], [0], [0], [1], [0, 0, 1, 1], [], []>} : vector<24x32xbf16>, vector<32x32xbf16>, vector<24x32xf32> -> vector<24x32xf32>
    %27 = arith.addf %24, %26 : vector<24x32xf32>
    %c0_21 = arith.constant 0 : index
    %c0_22 = arith.constant 0 : index
    %28 = vector.load %arg8[%c0_21, %c0_22] : memref<1x32xf32, #tpu.memory_space<vmem>>, vector<1x32xf32>
    %29 = vector.broadcast %28 : vector<1x32xf32> to vector<24x32xf32>
    %30 = arith.addf %27, %29 : vector<24x32xf32>
    %cst_23 = arith.constant 0.000000e+00 : f32
    %31 = vector.broadcast %cst_23 : f32 to vector<24x32xf32>
    %32 = arith.maximumf %30, %31 : vector<24x32xf32>
    %c0_24 = arith.constant 0 : index
    %c0_25 = arith.constant 0 : index
    %33 = vector.load %arg9[%c0_24, %c0_25] : memref<24x32xf32, #tpu.memory_space<vmem>>, vector<24x32xf32>
    tpu.vector_store %arg9[%c0_24, %c0_25], %32 {strides = array<i32>} : memref<24x32xf32, #tpu.memory_space<vmem>>, vector<24x32xf32>,
    return
  }
}

</mosaic_0001>

<bundles_post_ra>
// kernel: tpu_custom_call.1
= control target key start
LH: loop header
LB: loop body
LE: loop exit
PB: predicated region body
PF: predicated region fallthrough
CT: control target
= control target key end

     0   :  { %vm60_vm0 = vcmask 1043456   ;;  %vm53_vm1 = vcmask 195584   ;;  %v617_v6 = vmov 0   ;;  %vm134_vm2 = vcmask 64512   ;;  %s758_s0 = inlined_call_operand.vmem [shape: bf16[24,24], index: 0, kind: input, shape index: {}]   ;;  %s759_s1 = inlined_call_operand.vmem [shape: f32[24,1], index: 1, kind: input, shape index: {}]   ;;  %s760_s2 = inlined_call_operand.vmem [shape: f32[24,8], index: 2, kind: input, shape index: {}]   ;;  %s761_s3 = inlined_call_operand.vmem [shape: bf16[8,32], index: 3, kind: input, shape index: {}]   ;;  %s762_s4 = inlined_call_operand.vmem [shape: bf16[8,32], index: 4, kind: input, shape index: {}]   ;;  %s763_s5 = inlined_call_operand.vmem [shape: f32[1,32], index: 5, kind: input, shape index: {}]   ;;  %s764_s6 = inlined_call_operand.vmem [shape: bf16[32,32], index: 6, kind: input, shape index: {}]   ;;  %s765_s7 = inlined_call_operand.vmem [shape: bf16[32,32], index: 7, kind: input, shape index: {}]   ;;  %s766_s8 = inlined_call_operand.vmem [shape: f32[1,32], index: 8, kind: input, shape index: {}]   ;;  %s767_s9 = inlined_call_operand.hbm [shape: f32[24,32], index: 9, kind: output, shape index: {}]  }
   0x1   :  { %v40_v0 = vld [vmem:[%s760_s2] sm:$0xff]  ;;  %v41_v1 = vld [vmem:[%s760_s2 + $0x8] sm:$0xff]  ;;  %v42_v2 = vld [vmem:[%s760_s2 + $0x10] sm:$0xff]  ;;  %585 = vset.pattern.permute.xlu0 %v617_v6  ;;  %586 = vset.pattern.permute.xlu1 %v617_v6 }
   0x2   :  { %v43_v3 = vpack.c.bf16 %v41_v1, %v40_v0  ;;  %v44_v4 = vpack.c.bf16 %v42_v2, %v42_v2  ;;  %v587_v5 = vld [vmem:[%s758_s0] sm:$0xff]   ;;  %v39_v9 = vld [vmem:[%s759_s1 + $0x10] sm:$0xff]  ;;  %v38_v11 = vld [vmem:[%s759_s1 + $0x8] sm:$0xff] }
   0x3   :  { %v37_v7 = vld [vmem:[%s759_s1] sm:$0xff]  ;;  %537 = vmatprep.mubr.msk.bf16.mxu0 %vm53_vm1, %v587_v5  ;;  %124 = vperm.xlu1 %586, %v39_v9   ;;  %v588_v13 = vld [vmem:[%s758_s0 + $0x8] ss:$0 sps:$4 sm:$0xff]  }
   0x4   :  { %533 = vmatprep.subr.bf16.mxu0 %v43_v3  ;;  %v62_v8 = vsel %vm60_vm0, %v44_v4, 0  ;;  %v133_v10 = vld [vmem:[%s762_s4] sm:$0xf]  ;;  %114 = vperm.xlu0 %585, %v37_v7  }
   0x5   :  { %534 = vmatpush3.bf16.msra.mxu0 %v43_v3  ;;  %v141_v12 = vsel %vm60_vm0, %v133_v10, 0  ;;  %578 = vmatprep.subr.msk.bf16.mxu1 %vm60_vm0, %v133_v10 }
   0x6   :  { %577 = vmatprep.subr.msk.bf16.mxu0 %vm60_vm0, %v44_v4  ;;  %543 = vmatprep.mubr.msk.bf16.mxu1 %vm134_vm2, %v43_v3 }
   0x7   :  { %542 = vmatpush3.bf16.msra.mxu1 %v141_v12 }
   0x8   :  { %14 = vsyncpa [#allocation3], 0  ;;  %119 = vperm.xlu0 %585, %v38_v11   ;;  %v132_v14 = vld [vmem:[%s761_s3] sm:$0xf]  ;;  %v590_v33 = vld [vmem:[%s765_s7 + $0x8] sm:$0xff]   ;;  %vm339_vm3 = vcmask 261120  }
   0x9   :  { %536 = vmatpush3.bf16.msra.mxu0 %v62_v8  ;;  %579 = vmatprep.subr.msk.bf16.mxu1 %vm60_vm0, %v132_v14  ;;  %v198_v15 = vsel %vm60_vm0, %v132_v14, 0  ;;  %v589_v32 = vld [vmem:[%s765_s7] sm:$0xff]   ;;  %v592_v52 = vld [vmem:[%s764_s6 + $0x8] sm:$0xff]   ;;  %s618_s12 = smov [#allocation2]  }
   0xa   :  { %544 = vmatmul.mubr.msk.bf16.vlgmr.msra.gmra.mrb[0].mxu1 %vm134_vm2, %v44_v4  ;;  %v499_v35 = vld [vmem:[%s763_s5] ss:$0 sm:$0xff]  ;;  %s480_s13 = sshll.u32 %s618_s12, 4  ;;  %s481_s13 = int_to_ptr.vmem [resolvable:$true] %s480_s13 }
   0xb   :  { %548 = vmatpush3.bf16.msra.mxu1 %v198_v15  ;;  %v591_v51 = vld [vmem:[%s764_s6] sm:$0xff]   ;;  %p598_p1 = scmp.lt.s32.totalorder %s481_s13, %s481_s13 }
   0xc   :  { %538 = vmatmul.mubr.msk.bf16.vlgmr.msra.gmra.mrb[0].mxu0 %vm53_vm1, %v588_v13  ;;  %561 = vmatprep.subr.bf16.mxu1 %v589_v32  ;;  %v510_v3 = vld [vmem:[%s766_s8] ss:$0 sm:$0xff]  ;;  %s593_s8 = scalar_lea.vmem %s481_s13, 384 }
   0xd   :  { %557 = vmatprep.mubr.msk.bf16.mxu0 %vm53_vm1, %v587_v5  ;;  %p594_p0 = scmp.ne.s32.totalorder %s481_s13, %s593_s8  ;;  %p599_p2 = scmp.lt.s32.totalorder %s593_s8, %s593_s8 }
   0xf   :  { %p600_p3 = por %p599_p2, %p598_p1 }
  0x11   :  { %p601_p4 = pnand %p600_p3, %p594_p0 }
  0x82   :  { %v125_v17 = vpop.permute.xlu1 %124 }
  0x83   :  { %v712_v16 = vpop.permute.xlu0 %114 }
  0x87   :  { %v120_v25 = vpop.permute.xlu0 %119 }
  0xdd   :  { %v545_v18 = vpop.f32.mrb[0].mxu1 }
  0xde   :  { %v177_v20 = vpop.f32.mrb[1].mxu1 }
  0xdf   :  { %v539_v19 = vpop.f32.mrb[0].mxu0  ;;  %v546_v22 = vpop.f32.mrb[2].mxu1 }
  0xe0   :  { %v98_v21 = vpop.f32.mrb[1].mxu0  ;;  %v180_v24 = vpop.f32.mrb[3].mxu1  ;;  %v129_v26 = vmul.f32 %v539_v19, %v125_v17 }
  0xe1   :  { %v540_v23 = vpop.f32.mrb[2].mxu0  ;;  %v127_v28 = vmul.f32 %v712_v16, %v98_v21 }
  0xe2   :  { %v101_v27 = vpop.f32.mrb[3].mxu0  ;;  %v131_v31 = vpack.c.bf16 %v129_v26, %v129_v26 }
  0xe3   :  { %v128_v29 = vmul.f32 %v120_v25, %v101_v27 }
  0xe5   :  { %v130_v30 = vpack.c.bf16 %v128_v29, %v127_v28 }
  0xe7   :  { %549 = vmatprep.mubr.msk.bf16.mxu1 %vm134_vm2, %v130_v30 }
  0xe8   :  { %550 = vmatmul.mubr.msk.bf16.vlgmr.msra.gmra.mrb[4].mxu1 %vm134_vm2, %v131_v31 }
  0xe9   :  { %562 = vmatpush3.bf16.msra.mxu1 %v589_v32 }
  0xea   :  { %563 = vmatprep.subr.bf16.mxu1 %v590_v33 }
  0xed   :  { %564 = vmatpush3.bf16.msra.mxu1 %v590_v33 }
 0x1bb   :  { %v551_v34 = vpop.f32.mrb[4].mxu1 }
 0x1bc   :  { %v243_v36 = vadd.f32 %v551_v34, %v545_v18  ;;  %v234_v37 = vpop.f32.mrb[5].mxu1 }
 0x1bd   :  { %v235_v38 = vadd.f32 %v234_v37, %v177_v20  ;;  %v552_v39 = vpop.f32.mrb[6].mxu1 }
 0x1be   :  { %v257_v40 = vadd.f32 %v499_v35, %v243_v36  ;;  %v237_v41 = vpop.f32.mrb[7].mxu1 }
 0x1bf   :  { %v255_v42 = vadd.f32 %v499_v35, %v235_v38  ;;  %v238_v43 = vadd.f32 %v237_v41, %v180_v24 }
 0x1c0   :  { %v260_v45 = vmax.f32 %v257_v40, 0.0 }
 0x1c1   :  { %v256_v44 = vadd.f32 %v499_v35, %v238_v43  ;;  %v258_v46 = vmax.f32 %v255_v42, 0.0 }
 0x1c2   :  { %v262_v49 = vpack.c.bf16 %v260_v45, %v260_v45 }
 0x1c3   :  { %v259_v47 = vmax.f32 %v256_v44, 0.0 }
 0x1c4   :  { %v264_v50 = vsel %vm60_vm0, %v262_v49, 0 }
 0x1c5   :  { %v261_v48 = vpack.c.bf16 %v259_v47, %v258_v46 }
 0x1c7   :  { %553 = vmatprep.subr.bf16.mxu0 %v261_v48  ;;  %565 = vmatprep.mubr.msk.bf16.mxu1 %vm339_vm3, %v261_v48 }
 0x1c8   :  { %554 = vmatpush3.bf16.msra.mxu0 %v261_v48  ;;  %566 = vmatmul.mubr.msk.bf16.vlgmr.msra.gmra.mrb[8].mxu1 %vm339_vm3, %v262_v49 }
 0x1c9   :  { %580 = vmatprep.subr.msk.bf16.mxu0 %vm60_vm0, %v262_v49 }
 0x1cc   :  { %556 = vmatpush3.bf16.msra.mxu0 %v264_v50 }
 0x1cd   :  { %569 = vmatprep.subr.bf16.mxu0 %v591_v51 }
 0x1cf   :  { %558 = vmatmul.mubr.msk.bf16.vlgmr.msra.gmra.mrb[4].mxu0 %vm53_vm1, %v588_v13 }
 0x1d0   :  { %570 = vmatpush3.bf16.msra.mxu0 %v591_v51 }
 0x1d1   :  { %571 = vmatprep.subr.bf16.mxu0 %v592_v52 }
 0x1d4   :  { %572 = vmatpush3.bf16.msra.mxu0 %v592_v52 }
 0x29b   :  { %v567_v53 = vpop.f32.mrb[8].mxu1 }
 0x29c   :  { %v379_v54 = vpop.f32.mrb[9].mxu1 }
 0x29d   :  { %v568_v55 = vpop.f32.mrb[10].mxu1 }
 0x29e   :  { %v382_v56 = vpop.f32.mrb[11].mxu1 }
 0x2a2   :  { %v559_v57 = vpop.f32.mrb[4].mxu0 }
 0x2a3   :  { %v300_v58 = vpop.f32.mrb[5].mxu0  ;;  %v316_v60 = vmul.f32 %v559_v57, %v125_v17 }
 0x2a4   :  { %v560_v59 = vpop.f32.mrb[6].mxu0  ;;  %v314_v62 = vmul.f32 %v300_v58, %v712_v16 }
 0x2a5   :  { %v303_v61 = vpop.f32.mrb[7].mxu0  ;;  %v318_v1 = vpack.c.bf16 %v316_v60, %v316_v60 }
 0x2a6   :  { %v315_v63 = vmul.f32 %v303_v61, %v120_v25 }
 0x2a8   :  { %v317_v0 = vpack.c.bf16 %v315_v63, %v314_v62 }
 0x2aa   :  { %573 = vmatprep.mubr.msk.bf16.mxu0 %vm339_vm3, %v317_v0 }
 0x2ab   :  { %574 = vmatmul.mubr.msk.bf16.vlgmr.msra.gmra.mrb[8].mxu0 %vm339_vm3, %v318_v1 }
 0x37e   :  { %v575_v2 = vpop.f32.mrb[8].mxu0 }
 0x37f   :  { %v454_v4 = vadd.f32 %v575_v2, %v567_v53  ;;  %v445_v5 = vpop.f32.mrb[9].mxu0 }
 0x380   :  { %v446_v6 = vadd.f32 %v445_v5, %v379_v54  ;;  %v576_v7 = vpop.f32.mrb[10].mxu0 }
 0x381   :  { %v468_v8 = vadd.f32 %v510_v3, %v454_v4  ;;  %v448_v9 = vpop.f32.mrb[11].mxu0 }
 0x382   :  { %v466_v10 = vadd.f32 %v510_v3, %v446_v6  ;;  %v449_v11 = vadd.f32 %v448_v9, %v382_v56 }
 0x383   :  { %v471_v12 = vmax.f32 %v468_v8, 0.0 }
 0x384   :  { %v469_v13 = vmax.f32 %v466_v10, 0.0  ;;  %v467_v14 = vadd.f32 %v510_v3, %v449_v11 }
 0x385   :  { %474 = vst.msk [vmem:[#allocation2 + $0x10] sm:$0xff] %vm339_vm3, %v471_v12 }
 0x386   :  { %472 = vst.msk [vmem:[#allocation2] sm:$0xff] %vm339_vm3, %v469_v13  ;;  %v470_v15 = vmax.f32 %v467_v14, 0.0 }
 0x388   :  { %473 = vst.msk [vmem:[#allocation2 + $0x8] sm:$0xff] %vm339_vm3, %v470_v15 }
 0x389   :  { %604 = shalt.err (!%p601_p4)
}
 0x38a   :  { %s605_s16 = scalar_lea.hbm %s767_s9, 384 }
 0x38b   :  { %p606_p5 = scmp.ne.s32.totalorder %s767_s9, %s605_s16  ;;  %p609_p6 = scmp.lt.u32.totalorder %s605_s16, %s767_s9 }
 0x38d   :  { %p611_p7 = pnand %p609_p6, %p606_p5 }
 0x38f   :  { %614 = shalt.err (!%p611_p7)
}
 0x390   :  { %s619_s20 = smov 128   ;;  %s620_s21 = smov 8  }
 0x391   :  { %486 = dma.vmem_to_hbm [thread:$0]  %s481_s13, 384, %s767_s9, [#allocation3], %s619_s20, %s619_s20, %s620_s21  }
 0x392   :  { %615 = dma.done.wait [#allocation3], 384  }
 0x393   :  { %616 = vsyncadd [#allocation3], 4294966912 }
 0x394   :  { %490 = vsyncpa [#allocation3], 1 }

</bundles_post_ra>
